<compile_context>
chip_gen: v7x
topology: tpu7x:2x2x1
jax: 0.10.0
libtpu: 0.0.40
codegen_flags: <defaults>
</compile_context>

<pallas_src>
import functools

import jax
import jax.numpy as jnp
import numpy as np
from jax import lax
from jax.experimental import pallas as pl
from jax.experimental.pallas import tpu as pltpu


# ---------------------------------------------------------------------------
# Path A: single-pass kernel.  The whole (N, TILE_C, HW) channel slab of x is
# the grid block, so it is DMA'd from HBM exactly once; stats + normalize all
# happen on the VMEM-resident slab.
# ---------------------------------------------------------------------------
def _sbn_whole_kernel(cnt_ref, x_ref, m_ref, g_ref, b_ref, o_ref, acc_ref,
                      *, eps, n_batch):
    m = m_ref[...]                                        # (1, HW), values in {0, 1}

    def _for_each(body):
        if n_batch <= 8:                                  # small: static unroll
            for i in range(n_batch):
                body(i)
        else:                                             # large: scf.for
            lax.fori_loop(0, n_batch, lambda i, c: (body(i), c)[1], 0)

    # ---- pass 1: masked per-lane sums -> per-channel mean -------------------
    acc_ref[...] = jnp.zeros_like(acc_ref)

    def _sum(n):
        acc_ref[...] += x_ref[n].astype(jnp.float32) * m  # (TILE_C, HW), VPU only

    _for_each(_sum)
    inv_cnt = cnt_ref[0]                                  # 1 / (N * #active positions)
    mean = jnp.sum(acc_ref[...], axis=1, keepdims=True) * inv_cnt   # (TILE_C, 1)

    # ---- pass 2: centered sum of squares -> biased variance -----------------
    # x is VMEM-resident, so the second pass is free of HBM traffic and avoids
    # the E[x^2] - mean^2 cancellation issue.
    acc_ref[...] = jnp.zeros_like(acc_ref)

    def _sq(n):
        d = (x_ref[n].astype(jnp.float32) - mean) * m     # mask in {0,1}
        acc_ref[...] += d * d

    _for_each(_sq)
    var = jnp.sum(acc_ref[...], axis=1, keepdims=True) * inv_cnt
    inv_std = lax.rsqrt(var + eps)
    scale = g_ref[...] * inv_std                          # fold BN affine
    shift = b_ref[...] - mean * scale

    # ---- pass 3: normalize; inactive positions stay exactly 0 ---------------
    def _norm(n):
        x = x_ref[n].astype(jnp.float32)
        o_ref[n] = (m * (x * scale + shift)).astype(o_ref.dtype)

    _for_each(_norm)


# ---------------------------------------------------------------------------
# Path B (streaming fallback): two simple pallas_calls.
#   call 1: per-channel sum / sum-of-squares over (N, active positions)
#   call 2: out = mask * (x * scale + shift)
# ---------------------------------------------------------------------------
def _sbn_stats_kernel(x_ref, m_ref, s_ref, q_ref, acc_s, acc_q):
    l = pl.program_id(1)
    n = pl.program_id(2)

    @pl.when((l == 0) & (n == 0))
    def _init():
        acc_s[...] = jnp.zeros_like(acc_s)
        acc_q[...] = jnp.zeros_like(acc_q)

    xm = x_ref[...].astype(jnp.float32) * m_ref[...]      # (N_BLK, TILE_C, TILE_L)
    # reduce the N_BLK sub-axis first: one accumulator read+write per N_BLK samples
    acc_s[...] += jnp.sum(xm, axis=0)
    acc_q[...] += jnp.sum(xm * xm, axis=0)                # mask in {0,1}

    @pl.when((l == pl.num_programs(1) - 1) & (n == pl.num_programs(2) - 1))
    def _finalize():
        s_ref[...] = jnp.sum(acc_s[...], axis=1, keepdims=True)   # (TILE_C, 1)
        q_ref[...] = jnp.sum(acc_q[...], axis=1, keepdims=True)


def _sbn_norm_kernel(x_ref, m_ref, scale_ref, shift_ref, o_ref):
    x = x_ref[...].astype(jnp.float32)                    # (N_BLK, TILE_C, TILE_L)
    o_ref[...] = (m_ref[...] * (x * scale_ref[...] + shift_ref[...])
                  ).astype(o_ref.dtype)


# ---------------------------------------------------------------------------
# Generation-aware tiling helpers
# ---------------------------------------------------------------------------
def _vmem_capacity_bytes():
    try:
        return int(pltpu.get_tpu_info().vmem_capacity_bytes)
    except Exception:
        return 64 << 20          # conservative: v7x per-TensorCore VMEM


def _tile_c_candidates(C, itemsize):
    """Descending sublane-tile candidates (dtype-aware: bf16 -> 16-row tiles)."""
    sub = 16 if itemsize == 2 else 8
    cands = []
    if C % sub == 0:
        cands = [c for c in (128, 64, 32, 16, 8) if c % sub == 0 and C % c == 0]
    if not cands and C % 8 == 0:
        cands = [c for c in (128, 64, 32, 16, 8) if C % c == 0]
    if not cands:
        cands = [C]              # block dim == full array dim is always legal
    return cands


def _pick_whole_tile_c(N, C, HW, itemsize, budget):
    """TILE_C for the single-pass path, or None if no channel tile fits."""
    fitting = []
    for tc in _tile_c_candidates(C, itemsize):
        # 2x input + 2x output buffers, 1 accumulator + elementwise temps, mask
        ws = 4 * N * tc * HW * itemsize + 8 * tc * HW * 4 + 2 * HW * 4
        if ws <= budget:
            fitting.append(tc)
    if not fitting:
        return None
    # prefer nC >= 2 so the "parallel" channel axis can shard across v7x's 2 TCs
    multi = [tc for tc in fitting if C // tc >= 2]
    return (multi or fitting)[0]


def _pick_stream_tiles(N, C, HW, itemsize, budget):
    """(TILE_C, TILE_L, N_BLK) for the streaming fallback."""
    lane_divs = [d for d in (8192, 4096, 2048, 1024, 512, 256, 128)
                 if HW % d == 0] or [HW]
    nblk_divs = [d for d in (8, 4, 2, 1) if N % d == 0]
    cands = _tile_c_candidates(C, itemsize)
    for tc in cands:
        best, best_score = None, 0
        for tl in lane_divs:
            for nb in nblk_divs:
                foot = (4 * nb * tc * tl * itemsize      # 2x in + 2x out buffers
                        + 4 * tc * tl * 4                # accumulators + temps
                        + 2 * tl * 4)                    # mask block
                if foot <= budget and nb * tl > best_score:
                    best_score, best = nb * tl, (tc, tl, nb)
        if best is not None:
            return best
    # nothing fits the conservative budget: fall back to the SMALLEST tiles
    return cands[-1], lane_divs[-1], 1


# ---------------------------------------------------------------------------
# pallas_call wrappers
# ---------------------------------------------------------------------------
def _whole_tile_call(x3, m2, g2, b2, inv_count, *, eps, tile_c, vmem_limit):
    N, C, HW = x3.shape
    nC = C // tile_c
    kern = functools.partial(_sbn_whole_kernel, eps=eps, n_batch=N)
    return pl.pallas_call(
        kern,
        out_shape=jax.ShapeDtypeStruct((N, C, HW), x3.dtype),
        grid=(nC,),
        in_specs=[
            pl.BlockSpec(memory_space=pltpu.MemorySpace.SMEM),       # 1/count
            pl.BlockSpec((N, tile_c, HW), lambda c: (0, c, 0)),      # x slab
            pl.BlockSpec((1, HW), lambda c: (0, 0)),                 # mask (resident)
            pl.BlockSpec((tile_c, 1), lambda c: (c, 0)),             # gamma
            pl.BlockSpec((tile_c, 1), lambda c: (c, 0)),             # beta
        ],
        out_specs=pl.BlockSpec((N, tile_c, HW), lambda c: (0, c, 0)),
        scratch_shapes=[pltpu.VMEM((tile_c, HW), jnp.float32)],      # shared accumulator
        compiler_params=pltpu.CompilerParams(
            dimension_semantics=("parallel",),
            vmem_limit_bytes=vmem_limit),
    )(inv_count, x3, m2, g2, b2)


def _streaming_call(x3, m2, g2, b2, inv_count, *, eps, tiles, vmem_limit):
    N, C, HW = x3.shape
    tile_c, tile_l, n_blk = tiles
    nC, nL, nN = C // tile_c, HW // tile_l, N // n_blk

    # ---- pass 1: per-channel sum / sum-of-squares ---------------------------
    s, q = pl.pallas_call(
        _sbn_stats_kernel,
        out_shape=(jax.ShapeDtypeStruct((C, 1), jnp.float32),
                   jax.ShapeDtypeStruct((C, 1), jnp.float32)),
        grid=(nC, nL, nN),
        in_specs=[
            pl.BlockSpec((n_blk, tile_c, tile_l), lambda c, l, n: (n, c, l)),
            # mask block index constant over the inner n axis -> no re-DMA per sample
            pl.BlockSpec((1, tile_l), lambda c, l, n: (0, l)),
        ],
        out_specs=(pl.BlockSpec((tile_c, 1), lambda c, l, n: (c, 0)),
                   pl.BlockSpec((tile_c, 1), lambda c, l, n: (c, 0))),
        scratch_shapes=[pltpu.VMEM((tile_c, tile_l), jnp.float32),
                        pltpu.VMEM((tile_c, tile_l), jnp.float32)],
        compiler_params=pltpu.CompilerParams(
            dimension_semantics=("parallel", "arbitrary", "arbitrary"),
            vmem_limit_bytes=vmem_limit),
    )(x3, m2)

    # ---- tiny affine fold in plain XLA --------------------------------------
    mean = s * inv_count
    ex2 = q * inv_count
    var = jnp.maximum(ex2 - mean * mean, 0.0)             # biased variance, clamped
    inv_std = lax.rsqrt(var + jnp.float32(eps))
    scale = g2 * inv_std
    shift = b2 - mean * scale

    # ---- pass 2: normalize ---------------------------------------------------
    out3 = pl.pallas_call(
        _sbn_norm_kernel,
        out_shape=jax.ShapeDtypeStruct((N, C, HW), x3.dtype),
        grid=(nC, nL, nN),
        in_specs=[
            pl.BlockSpec((n_blk, tile_c, tile_l), lambda c, l, n: (n, c, l)),
            pl.BlockSpec((1, tile_l), lambda c, l, n: (0, l)),
            pl.BlockSpec((tile_c, 1), lambda c, l, n: (c, 0)),
            pl.BlockSpec((tile_c, 1), lambda c, l, n: (c, 0)),
        ],
        out_specs=pl.BlockSpec((n_blk, tile_c, tile_l), lambda c, l, n: (n, c, l)),
        compiler_params=pltpu.CompilerParams(
            dimension_semantics=("parallel", "parallel", "arbitrary"),
            vmem_limit_bytes=vmem_limit),
    )(x3, m2, scale, shift)
    return out3


def sparse_batch_norm(x_nchw, mask_hw, gamma, beta, *, eps=1e-5,
                      force_streaming=False, _stream_tiles=None):
    """Forward of SparseBatchNorm (training mode, static spatial mask).

    x_nchw : (N, C, H, W)      (NCHW, as in PyTorch)
    mask_hw: (H, W) {0,1} mask, or None for a plain dense BatchNorm1d
    gamma, beta : (C,) affine BatchNorm parameters
    Returns (N, C, H, W), same dtype as the input.
    """
    N, C, H, W = x_nchw.shape
    HW = H * W
    if mask_hw is None:
        mask_hw = jnp.ones((H, W), jnp.float32)

    # Free reshapes only -- no transposes, no N-fold mask tiling.
    x3 = x_nchw.reshape(N, C, HW)
    m2 = mask_hw.reshape(1, HW).astype(jnp.float32)
    g2 = gamma.reshape(C, 1).astype(jnp.float32)
    b2 = beta.reshape(C, 1).astype(jnp.float32)

    # Static-mask active count (tiny reduce over H*W); guard the all-zero mask.
    count = jnp.sum(m2) * jnp.float32(N)
    inv_count = (1.0 / jnp.maximum(count, 1.0)).astype(jnp.float32)

    itemsize = x_nchw.dtype.itemsize
    cap = _vmem_capacity_bytes()
    budget = (cap * 11) // 20                      # ~55% of VMEM for the working set
    vmem_limit = min((cap * 9) // 10, 100 << 20)   # raise the default scoped limit

    tc_whole = None if force_streaming else _pick_whole_tile_c(N, C, HW, itemsize, budget)

    if tc_whole is not None:
        out3 = _whole_tile_call(x3, m2, g2, b2, inv_count.reshape((1,)),
                                eps=eps, tile_c=tc_whole, vmem_limit=vmem_limit)
    else:
        tiles = _stream_tiles or _pick_stream_tiles(N, C, HW, itemsize, budget)
        out3 = _streaming_call(x3, m2, g2, b2, inv_count,
                               eps=eps, tiles=tiles, vmem_limit=vmem_limit)
    return out3.reshape(N, C, H, W)


# ---------------------------------------------------------------------------
# Pure-numpy reference (replicates the PyTorch training-mode forward)
# ---------------------------------------------------------------------------
def _reference_numpy(x, mask, gamma, beta, eps=1e-5):
    N, C, H, W = x.shape
    x3 = x.reshape(N, C, H * W)
    sel_ix = mask.reshape(-1).astype(bool)
    out = x3 * mask.reshape(1, 1, -1).astype(np.float32)   # MaskedActivation
    sel = x3[:, :, sel_ix]                                  # (N, C, k)
    mean = sel.mean(axis=(0, 2))
    var = sel.var(axis=(0, 2))                              # biased, BN training
    norm = (sel - mean[None, :, None]) / np.sqrt(var[None, :, None] + eps)
    out[:, :, sel_ix] = gamma[None, :, None] * norm + beta[None, :, None]
    return out.reshape(N, C, H, W)


if __name__ == "__main__":
    key = jax.random.PRNGKey(0)
    kx, km, kg, kb, kx2, km2, kg2, kb2 = jax.random.split(key, 8)

    # ---- small case: exercises the single-pass (whole-slab) path ------------
    N, C, H, W = 2, 4, 16, 16
    x = jax.random.normal(kx, (N, C, H, W), dtype=jnp.float32)
    mask = (jax.random.uniform(km, (H, W)) < 0.5).astype(jnp.float32)
    gamma = 1.0 + 0.1 * jax.random.normal(kg, (C,), dtype=jnp.float32)
    beta = 0.1 * jax.random.normal(kb, (C,), dtype=jnp.float32)

    out = jax.block_until_ready(sparse_batch_norm(x, mask, gamma, beta))
    ref = _reference_numpy(np.asarray(x), np.asarray(mask),
                           np.asarray(gamma), np.asarray(beta))
    np.testing.assert_allclose(np.asarray(out), ref, rtol=1e-4, atol=1e-4)

    # ---- second case: force the streaming fallback with a multi-step grid ---
    N2, C2, H2, W2 = 4, 8, 16, 32
    x2 = jax.random.normal(kx2, (N2, C2, H2, W2), dtype=jnp.float32)
    mask2 = (jax.random.uniform(km2, (H2, W2)) < 0.6).astype(jnp.float32)
    gamma2 = 1.0 + 0.1 * jax.random.normal(kg2, (C2,), dtype=jnp.float32)
    beta2 = 0.1 * jax.random.normal(kb2, (C2,), dtype=jnp.float32)

    out2 = jax.block_until_ready(
        sparse_batch_norm(x2, mask2, gamma2, beta2,
                          force_streaming=True, _stream_tiles=(8, 128, 2)))
    ref2 = _reference_numpy(np.asarray(x2), np.asarray(mask2),
                            np.asarray(gamma2), np.asarray(beta2))
    np.testing.assert_allclose(np.asarray(out2), ref2, rtol=1e-4, atol=1e-4)

    # TODO(synk): running_mean/running_var buffer updates, the dynamic-mask
    # reshuffle (torch.randperm state) and the eval-mode dense_inference branch
    # are stateful / eval-only bookkeeping and are not implemented here (they do
    # not affect the training-mode forward output).
    print("KERNEL_OK")
</pallas_src>

<mosaic_0001>
module attributes {stable_mosaic.version = 11 : i64} {
  func.func @_sbn_whole_kernel(%arg0: i32, %arg1: memref<1xf32, #tpu.memory_space<smem>>, %arg2: memref<2x4x256xf32, #tpu.memory_space<vmem>>, %arg3: memref<1x256xf32, #tpu.memory_space<vmem>>, %arg4: memref<4x1xf32, #tpu.memory_space<vmem>>, %arg5: memref<4x1xf32, #tpu.memory_space<vmem>>, %arg6: memref<2x4x256xf32, #tpu.memory_space<vmem>>, %arg7: memref<4x256xf32, #tpu.memory_space<vmem>>) attributes {dimension_semantics = [#tpu.dimension_semantics<parallel>], iteration_bounds = array<i64: 1>, scalar_prefetch = 0 : i64, scratch_operands = 1 : i64, tpu.core_type = #tpu.core_type<tc>, window_params = [{transform_indices = @transform_0, window_bounds = array<i64: 1>}, {transform_indices = @transform_1, window_bounds = array<i64: 2, 4, 256>}, {pipeline_mode = #tpu.pipeline_mode<synchronous>, transform_indices = @transform_2, window_bounds = array<i64: 1, 256>}, {transform_indices = @transform_3, window_bounds = array<i64: 4, 1>}, {transform_indices = @transform_4, window_bounds = array<i64: 4, 1>}, {transform_indices = @transform_5, window_bounds = array<i64: 2, 4, 256>}]} {
    %c0 = arith.constant 0 : index
    %c0_0 = arith.constant 0 : index
    %0 = vector.load %arg3[%c0, %c0_0] : memref<1x256xf32, #tpu.memory_space<vmem>>, vector<1x256xf32>
    %cst = arith.constant 0.000000e+00 : f32
    %1 = vector.broadcast %cst : f32 to vector<4x256xf32>
    %c0_1 = arith.constant 0 : index
    %c0_2 = arith.constant 0 : index
    %2 = vector.load %arg7[%c0_1, %c0_2] : memref<4x256xf32, #tpu.memory_space<vmem>>, vector<4x256xf32>
    tpu.vector_store %arg7[%c0_1, %c0_2], %1 {strides = array<i32>} : memref<4x256xf32, #tpu.memory_space<vmem>>, vector<4x256xf32>,
    %c0_3 = arith.constant 0 : index
    %c0_4 = arith.constant 0 : index
    %3 = vector.load %arg7[%c0_3, %c0_4] : memref<4x256xf32, #tpu.memory_space<vmem>>, vector<4x256xf32>
    %c0_5 = arith.constant 0 : index
    %c0_6 = arith.constant 0 : index
    %c0_7 = arith.constant 0 : index
    %4 = vector.load %arg2[%c0_5, %c0_6, %c0_7] : memref<2x4x256xf32, #tpu.memory_space<vmem>>, vector<1x4x256xf32>
    %5 = vector.shape_cast %4 : vector<1x4x256xf32> to vector<4x256xf32>
    %6 = vector.broadcast %0 : vector<1x256xf32> to vector<4x256xf32>
    %7 = arith.mulf %5, %6 : vector<4x256xf32>
    %8 = arith.addf %3, %7 : vector<4x256xf32>
    %c0_8 = arith.constant 0 : index
    %c0_9 = arith.constant 0 : index
    %9 = vector.load %arg7[%c0_8, %c0_9] : memref<4x256xf32, #tpu.memory_space<vmem>>, vector<4x256xf32>
    tpu.vector_store %arg7[%c0_8, %c0_9], %8 {strides = array<i32>} : memref<4x256xf32, #tpu.memory_space<vmem>>, vector<4x256xf32>,
    %c0_10 = arith.constant 0 : index
    %c0_11 = arith.constant 0 : index
    %10 = vector.load %arg7[%c0_10, %c0_11] : memref<4x256xf32, #tpu.memory_space<vmem>>, vector<4x256xf32>
    %c1 = arith.constant 1 : index
    %c0_12 = arith.constant 0 : index
    %c0_13 = arith.constant 0 : index
    %11 = vector.load %arg2[%c1, %c0_12, %c0_13] : memref<2x4x256xf32, #tpu.memory_space<vmem>>, vector<1x4x256xf32>
    %12 = vector.shape_cast %11 : vector<1x4x256xf32> to vector<4x256xf32>
    %13 = vector.broadcast %0 : vector<1x256xf32> to vector<4x256xf32>
    %14 = arith.mulf %12, %13 : vector<4x256xf32>
    %15 = arith.addf %10, %14 : vector<4x256xf32>
    %c0_14 = arith.constant 0 : index
    %c0_15 = arith.constant 0 : index
    %16 = vector.load %arg7[%c0_14, %c0_15] : memref<4x256xf32, #tpu.memory_space<vmem>>, vector<4x256xf32>
    tpu.vector_store %arg7[%c0_14, %c0_15], %15 {strides = array<i32>} : memref<4x256xf32, #tpu.memory_space<vmem>>, vector<4x256xf32>,
    %c0_16 = arith.constant 0 : index
    %17 = memref.load %arg1[%c0_16] : memref<1xf32, #tpu.memory_space<smem>>
    %c0_17 = arith.constant 0 : index
    %c0_18 = arith.constant 0 : index
    %18 = vector.load %arg7[%c0_17, %c0_18] : memref<4x256xf32, #tpu.memory_space<vmem>>, vector<4x256xf32>
    %cst_19 = arith.constant dense<0.000000e+00> : vector<4xf32>
    %19 = vector.multi_reduction <add>, %18, %cst_19 [1] : vector<4x256xf32> to vector<4xf32>
    %20 = vector.shape_cast %19 : vector<4xf32> to vector<4x1xf32>
    %21 = vector.broadcast %17 : f32 to vector<4x1xf32>
    %22 = arith.mulf %20, %21 : vector<4x1xf32>
    %cst_20 = arith.constant 0.000000e+00 : f32
    %23 = vector.broadcast %cst_20 : f32 to vector<4x256xf32>
    %c0_21 = arith.constant 0 : index
    %c0_22 = arith.constant 0 : index
    %24 = vector.load %arg7[%c0_21, %c0_22] : memref<4x256xf32, #tpu.memory_space<vmem>>, vector<4x256xf32>
    tpu.vector_store %arg7[%c0_21, %c0_22], %23 {strides = array<i32>} : memref<4x256xf32, #tpu.memory_space<vmem>>, vector<4x256xf32>,
    %c0_23 = arith.constant 0 : index
    %c0_24 = arith.constant 0 : index
    %c0_25 = arith.constant 0 : index
    %25 = vector.load %arg2[%c0_23, %c0_24, %c0_25] : memref<2x4x256xf32, #tpu.memory_space<vmem>>, vector<1x4x256xf32>
    %26 = vector.shape_cast %25 : vector<1x4x256xf32> to vector<4x256xf32>
    %27 = vector.broadcast %22 : vector<4x1xf32> to vector<4x256xf32>
    %28 = arith.subf %26, %27 : vector<4x256xf32>
    %29 = vector.broadcast %0 : vector<1x256xf32> to vector<4x256xf32>
    %30 = arith.mulf %28, %29 : vector<4x256xf32>
    %c0_26 = arith.constant 0 : index
    %c0_27 = arith.constant 0 : index
    %31 = vector.load %arg7[%c0_26, %c0_27] : memref<4x256xf32, #tpu.memory_space<vmem>>, vector<4x256xf32>
    %32 = arith.mulf %30, %30 : vector<4x256xf32>
    %33 = arith.addf %31, %32 : vector<4x256xf32>
    %c0_28 = arith.constant 0 : index
    %c0_29 = arith.constant 0 : index
    %34 = vector.load %arg7[%c0_28, %c0_29] : memref<4x256xf32, #tpu.memory_space<vmem>>, vector<4x256xf32>
    tpu.vector_store %arg7[%c0_28, %c0_29], %33 {strides = array<i32>} : memref<4x256xf32, #tpu.memory_space<vmem>>, vector<4x256xf32>,
    %c1_30 = arith.constant 1 : index
    %c0_31 = arith.constant 0 : index
    %c0_32 = arith.constant 0 : index
    %35 = vector.load %arg2[%c1_30, %c0_31, %c0_32] : memref<2x4x256xf32, #tpu.memory_space<vmem>>, vector<1x4x256xf32>
    %36 = vector.shape_cast %35 : vector<1x4x256xf32> to vector<4x256xf32>
    %37 = vector.broadcast %22 : vector<4x1xf32> to vector<4x256xf32>
    %38 = arith.subf %36, %37 : vector<4x256xf32>
    %39 = vector.broadcast %0 : vector<1x256xf32> to vector<4x256xf32>
    %40 = arith.mulf %38, %39 : vector<4x256xf32>
    %c0_33 = arith.constant 0 : index
    %c0_34 = arith.constant 0 : index
    %41 = vector.load %arg7[%c0_33, %c0_34] : memref<4x256xf32, #tpu.memory_space<vmem>>, vector<4x256xf32>
    %42 = arith.mulf %40, %40 : vector<4x256xf32>
    %43 = arith.addf %41, %42 : vector<4x256xf32>
    %c0_35 = arith.constant 0 : index
    %c0_36 = arith.constant 0 : index
    %44 = vector.load %arg7[%c0_35, %c0_36] : memref<4x256xf32, #tpu.memory_space<vmem>>, vector<4x256xf32>
    tpu.vector_store %arg7[%c0_35, %c0_36], %43 {strides = array<i32>} : memref<4x256xf32, #tpu.memory_space<vmem>>, vector<4x256xf32>,
    %c0_37 = arith.constant 0 : index
    %c0_38 = arith.constant 0 : index
    %45 = vector.load %arg7[%c0_37, %c0_38] : memref<4x256xf32, #tpu.memory_space<vmem>>, vector<4x256xf32>
    %cst_39 = arith.constant dense<0.000000e+00> : vector<4xf32>
    %46 = vector.multi_reduction <add>, %45, %cst_39 [1] : vector<4x256xf32> to vector<4xf32>
    %47 = vector.shape_cast %46 : vector<4xf32> to vector<4x1xf32>
    %48 = vector.broadcast %17 : f32 to vector<4x1xf32>
    %49 = arith.mulf %47, %48 : vector<4x1xf32>
    %cst_40 = arith.constant 9.99999974E-6 : f32
    %50 = vector.broadcast %cst_40 : f32 to vector<4x1xf32>
    %51 = arith.addf %49, %50 : vector<4x1xf32>
    %52 = math.rsqrt %51 : vector<4x1xf32>
    %c0_41 = arith.constant 0 : index
    %c0_42 = arith.constant 0 : index
    %53 = vector.load %arg4[%c0_41, %c0_42] : memref<4x1xf32, #tpu.memory_space<vmem>>, vector<4x1xf32>
    %54 = arith.mulf %53, %52 : vector<4x1xf32>
    %c0_43 = arith.constant 0 : index
    %c0_44 = arith.constant 0 : index
    %55 = vector.load %arg5[%c0_43, %c0_44] : memref<4x1xf32, #tpu.memory_space<vmem>>, vector<4x1xf32>
    %56 = arith.mulf %22, %54 : vector<4x1xf32>
    %57 = arith.subf %55, %56 : vector<4x1xf32>
    %c0_45 = arith.constant 0 : index
    %c0_46 = arith.constant 0 : index
    %c0_47 = arith.constant 0 : index
    %58 = vector.load %arg2[%c0_45, %c0_46, %c0_47] : memref<2x4x256xf32, #tpu.memory_space<vmem>>, vector<1x4x256xf32>
    %59 = vector.shape_cast %58 : vector<1x4x256xf32> to vector<4x256xf32>
    %60 = vector.broadcast %54 : vector<4x1xf32> to vector<4x256xf32>
    %61 = arith.mulf %59, %60 : vector<4x256xf32>
    %62 = vector.broadcast %57 : vector<4x1xf32> to vector<4x256xf32>
    %63 = arith.addf %61, %62 : vector<4x256xf32>
    %64 = vector.broadcast %0 : vector<1x256xf32> to vector<4x256xf32>
    %65 = arith.mulf %64, %63 : vector<4x256xf32>
    %c0_48 = arith.constant 0 : index
    %c0_49 = arith.constant 0 : index
    %c0_50 = arith.constant 0 : index
    %66 = vector.load %arg6[%c0_48, %c0_49, %c0_50] : memref<2x4x256xf32, #tpu.memory_space<vmem>>, vector<1x4x256xf32>
    %67 = vector.shape_cast %66 : vector<1x4x256xf32> to vector<4x256xf32>
    %68 = vector.shape_cast %65 : vector<4x256xf32> to vector<1x4x256xf32>
    tpu.vector_store %arg6[%c0_48, %c0_49, %c0_50], %68 {strides = array<i32>} : memref<2x4x256xf32, #tpu.memory_space<vmem>>, vector<1x4x256xf32>,
    %c1_51 = arith.constant 1 : index
    %c0_52 = arith.constant 0 : index
    %c0_53 = arith.constant 0 : index
    %69 = vector.load %arg2[%c1_51, %c0_52, %c0_53] : memref<2x4x256xf32, #tpu.memory_space<vmem>>, vector<1x4x256xf32>
    %70 = vector.shape_cast %69 : vector<1x4x256xf32> to vector<4x256xf32>
    %71 = vector.broadcast %54 : vector<4x1xf32> to vector<4x256xf32>
    %72 = arith.mulf %70, %71 : vector<4x256xf32>
    %73 = vector.broadcast %57 : vector<4x1xf32> to vector<4x256xf32>
    %74 = arith.addf %72, %73 : vector<4x256xf32>
    %75 = vector.broadcast %0 : vector<1x256xf32> to vector<4x256xf32>
    %76 = arith.mulf %75, %74 : vector<4x256xf32>
    %c1_54 = arith.constant 1 : index
    %c0_55 = arith.constant 0 : index
    %c0_56 = arith.constant 0 : index
    %77 = vector.load %arg6[%c1_54, %c0_55, %c0_56] : memref<2x4x256xf32, #tpu.memory_space<vmem>>, vector<1x4x256xf32>
    %78 = vector.shape_cast %77 : vector<1x4x256xf32> to vector<4x256xf32>
    %79 = vector.shape_cast %76 : vector<4x256xf32> to vector<1x4x256xf32>
    tpu.vector_store %arg6[%c1_54, %c0_55, %c0_56], %79 {strides = array<i32>} : memref<2x4x256xf32, #tpu.memory_space<vmem>>, vector<1x4x256xf32>,
    return
  }
  func.func @transform_0(%arg0: i32) -> i32 {
    %c0_i32 = arith.constant 0 : i32
    %c0_i32_0 = arith.constant 0 : i32
    return %c0_i32 : i32
  }
  func.func @transform_1(%arg0: i32) -> (i32, i32, i32) {
    %c0_i32 = arith.constant 0 : i32
    %c0_i32_0 = arith.constant 0 : i32
    %c0_i32_1 = arith.constant 0 : i32
    return %c0_i32, %arg0, %c0_i32_0 : i32, i32, i32
  }
  func.func @transform_2(%arg0: i32) -> (i32, i32) {
    %c0_i32 = arith.constant 0 : i32
    %c0_i32_0 = arith.constant 0 : i32
    %c0_i32_1 = arith.constant 0 : i32
    return %c0_i32, %c0_i32_0 : i32, i32
  }
  func.func @transform_3(%arg0: i32) -> (i32, i32) {
    %c0_i32 = arith.constant 0 : i32
    %c0_i32_0 = arith.constant 0 : i32
    return %arg0, %c0_i32 : i32, i32
  }
  func.func @transform_4(%arg0: i32) -> (i32, i32) {
    %c0_i32 = arith.constant 0 : i32
    %c0_i32_0 = arith.constant 0 : i32
    return %arg0, %c0_i32 : i32, i32
  }
  func.func @transform_5(%arg0: i32) -> (i32, i32, i32) {
    %c0_i32 = arith.constant 0 : i32
    %c0_i32_0 = arith.constant 0 : i32
    %c0_i32_1 = arith.constant 0 : i32
    return %c0_i32, %arg0, %c0_i32_0 : i32, i32, i32
  }
}

</mosaic_0001>

<bundles_post_ra>
// kernel: tpu_custom_call.1
= control target key start
LH: loop header
LB: loop body
LE: loop exit
PB: predicated region body
PF: predicated region fallthrough
CT: control target
= control target key end

     0   :  { %11 = vsyncpa [#allocation5], 0  ;;  %s334_s0 = inlined_call_operand.<no memory space> [shape: f32[1], index: 0, kind: input, shape index: {}]   ;;  %s335_s1 = inlined_call_operand.hbm [shape: f32[2,4,256], index: 1, kind: input, shape index: {}]   ;;  %s336_s2 = inlined_call_operand.vmem [shape: f32[1,256], index: 2, kind: input, shape index: {}]   ;;  %s337_s3 = inlined_call_operand.vmem [shape: f32[4,1], index: 3, kind: input, shape index: {}]   ;;  %s338_s4 = inlined_call_operand.vmem [shape: f32[4,1], index: 4, kind: input, shape index: {}]   ;;  %s339_s5 = inlined_call_operand.hbm [shape: f32[2,4,256], index: 5, kind: output, shape index: {}]  }
   0x1   :  { %12 = vsyncpa [#allocation6], 0  ;;  %s242_s18 = smov [#allocation4]   ;;  %s194_s22 = scalar_lea.hbm %s335_s1, 256 }
   0x2   :  { %s20_s19 = sshll.u32 %s242_s18, 4  ;;  %p195_p0 = scmp.ne.s32.totalorder %s335_s1, %s194_s22  ;;  %s21_s19 = int_to_ptr.vmem [resolvable:$true] %s20_s19 }
   0x3   :  { %p198_p1 = scmp.lt.u32.totalorder %s194_s22, %s335_s1 }
   0x5   :  { %p200_p2 = pnand %p198_p1, %p195_p0 }
   0x7   :  { %203 = shalt.err (!%p200_p2)
}
   0x8   :  { %s204_s27 = scalar_lea.vmem %s21_s19, 256  ;;  %p209_p4 = scmp.lt.s32.totalorder %s21_s19, %s21_s19 }
   0x9   :  { %p205_p3 = scmp.ne.s32.totalorder %s21_s19, %s204_s27  ;;  %p210_p5 = scmp.lt.s32.totalorder %s204_s27, %s204_s27 }
   0xb   :  { %p211_p6 = por %p210_p5, %p209_p4 }
   0xd   :  { %p212_p7 = pnand %p211_p6, %p205_p3 }
   0xf   :  { %215 = shalt.err (!%p212_p7)
}
  0x10   :  { %s243_s28 = smov 128   ;;  %s244_s29 = smov 8  }
  0x11   :  { %26 = dma.hbm_to_vmem [thread:$0]  %s335_s1, 256, %s21_s19, [#allocation5], %s243_s28, %s243_s28, %s244_s29  }
  0x12   :  { %238 = dma.done.wait [#allocation5], 256  }
  0x13   :  { %239 = vsyncadd [#allocation5], 4294967040  ;;  %v41_v0 = vlaneseq  ;;  %v36_v4 = vld [vmem:[%s336_s2] sm:$0x3]  ;;  %v58_v8 = vld [vmem:[#allocation4 + $0x8] sm:$0xff]  ;;  %vm67_vm0 = vcmask 1043456   ;;  %v73_v20 = vstv %s334_s0 }
  0x14   :  { %v39_v7 = vld [vmem:[#allocation4] sm:$0xff]  ;;  %v245_v17 = vmov 839922192   ;;  %v246_v36 = vmov 0  }
  0x15   :  { %v42_v1 = vshrl.u32 %v41_v0, 7  ;;  %v79_v18 = vunpack.c.l.s4 %v245_v17  ;;  %190 = vset.pattern.permute.xlu1 %v246_v36  ;;  %191 = vset.pattern.permute.xlu0 %v246_v36  ;;  %v111_v40 = vld [vmem:[%s337_s3] sm:$0xf]  ;;  %s247_s3 = smov [#allocation7]  }
  0x16   :  { %v113_v43 = vld [vmem:[%s338_s4] sm:$0xf]  ;;  %s172_s12 = sshll.u32 %s247_s3, 4  ;;  %s173_s12 = int_to_ptr.vmem [resolvable:$true] %s172_s12 }
  0x17   :  { %v43_v2 = vsub.s32 0, %v42_v1  ;;  %v47_v3 = vsub.s32 1, %v42_v1  ;;  %v80_v19 = vunpack.c.0.s8 %v79_v18  ;;  %s216_s4 = scalar_lea.vmem %s173_s12, 256  ;;  %p221_p9 = scmp.lt.s32.totalorder %s173_s12, %s173_s12 }
  0x18   :  { %p217_p8 = scmp.ne.s32.totalorder %s173_s12, %s216_s4  ;;  %p222_p10 = scmp.lt.s32.totalorder %s216_s4, %s216_s4 }
  0x19   :  { %v296_v5 = vrot.slane %v36_v4, %v43_v2  ;;  %v298_v6 = vrot.slane %v36_v4, %v47_v3  ;;  %v83_v21 = vsub.s32 %v80_v19, %v42_v1 }
  0x1a   :  { %p223_p11 = por %p222_p10, %p221_p9 }
  0x1b   :  { %v51_v9 = vcombine.low %v296_v5, %v298_v6 }
  0x1c   :  { %p224_p12 = pnand %p223_p11, %p217_p8 }
  0x1d   :  { %v53_v10 = vmul.f32 %v51_v9, %v39_v7  ;;  %v59_v11 = vmul.f32 %v58_v8, %v51_v9 }
  0x1f   :  { %v60_v12 = vadd.f32 %v59_v11, %v53_v10 }
  0x21   :  { %v65_v13 = vcombine.high %v60_v12, %v60_v12  ;;  %v68_v14 = vsel %vm67_vm0, %v60_v12, 0.0 }
  0x23   :  { %v69_v15 = vsel %vm67_vm0, %v65_v13, 0.0 }
  0x24   :  { %v70_v16 = vadd.f32 %v69_v15, %v68_v14 }
  0x26   :  { %71 = vadd.xlane.f32.xlu0 %v70_v16 }
  0xb3   :  { %v72_v22 = vpop.xlane.xlu0 %71 }
  0xb4   :  { %v74_v23 = vmul.f32 %v73_v20, %v72_v22 }
  0xb6   :  { %v84_v24 = vrot.slane %v74_v23, %v83_v21 }
  0xb8   :  { %v86_v25 = vsub.f32 %v39_v7, %v84_v24  ;;  %v93_v26 = vsub.f32 %v58_v8, %v84_v24 }
  0xba   :  { %v87_v27 = vmul.f32 %v86_v25, %v51_v9  ;;  %v94_v28 = vmul.f32 %v93_v26, %v51_v9 }
  0xbc   :  { %v89_v29 = vmul.f32 %v87_v27, %v87_v27  ;;  %v96_v30 = vmul.f32 %v94_v28, %v94_v28 }
  0xbe   :  { %v97_v31 = vadd.f32 %v96_v30, %v89_v29 }
  0xc0   :  { %v101_v32 = vcombine.high %v97_v31, %v97_v31  ;;  %v103_v33 = vsel %vm67_vm0, %v97_v31, 0.0 }
  0xc2   :  { %v104_v34 = vsel %vm67_vm0, %v101_v32, 0.0 }
  0xc3   :  { %v105_v35 = vadd.f32 %v104_v34, %v103_v33 }
  0xc5   :  { %106 = vadd.xlane.f32.xlu0 %v105_v35 }
 0x152   :  { %v107_v37 = vpop.xlane.xlu0 %106 }
 0x153   :  { %v108_v38 = vmul.f32 %v107_v37, %v73_v20 }
 0x155   :  { %v109_v39 = vadd.f32 1e-05, %v108_v38 }
 0x157   :  { %192 = vrsqrt.f32 %v109_v39 }
 0x161   :  { %v193_v41 = vpop.eup %192 }
 0x162   :  { %v112_v42 = vmul.f32 %v193_v41, %v111_v40 }
 0x164   :  { %119 = vperm.xlu1 %190, %v112_v42   ;;  %v114_v44 = vmul.f32 %v112_v42, %v74_v23 }
 0x166   :  { %v115_v45 = vsub.f32 %v113_v43, %v114_v44 }
 0x168   :  { %132 = vperm.xlu1 %190, %v115_v45  }
 0x1e3   :  { %v120_v46 = vpop.permute.xlu1 %119 }
 0x1e4   :  { %v127_v47 = vrot.slane %v120_v46, %v83_v21 }
 0x1e6   :  { %v129_v49 = vmul.f32 %v127_v47, %v39_v7  ;;  %v154_v50 = vmul.f32 %v127_v47, %v58_v8 }
 0x1e7   :  { %v133_v48 = vpop.permute.xlu1 %132 }
 0x1e8   :  { %v140_v51 = vrot.slane %v133_v48, %v83_v21 }
 0x1ea   :  { %v142_v52 = vadd.f32 %v140_v51, %v129_v49  ;;  %v155_v53 = vadd.f32 %v154_v50, %v140_v51 }
 0x1ec   :  { %v144_v54 = vcombine.high %v142_v52, %v142_v52  ;;  %v157_v55 = vcombine.high %v155_v53, %v155_v53  ;;  %v146_v56 = vmul.f32 %v142_v52, %v296_v5  ;;  %v159_v58 = vmul.f32 %v155_v53, %v296_v5 }
 0x1ee   :  { %v147_v57 = vmul.f32 %v144_v54, %v298_v6  ;;  %v160_v59 = vmul.f32 %v157_v55, %v298_v6 }
 0x1f0   :  { %v150_v60 = vcombine.low %v146_v56, %v147_v57  ;;  %v163_v61 = vcombine.low %v159_v58, %v160_v59 }
 0x1f2   :  { %152 = vst [vmem:[#allocation7] sm:$0xff] %v150_v60  ;;  %166 = vst [vmem:[#allocation7 + $0x8] sm:$0xff] %v163_v61 }
 0x1f3   :  { %227 = shalt.err (!%p224_p12)
}
 0x1f4   :  { %s228_s15 = scalar_lea.hbm %s339_s5, 256 }
 0x1f5   :  { %p229_p13 = scmp.ne.s32.totalorder %s339_s5, %s228_s15  ;;  %p232_p0 = scmp.lt.u32.totalorder %s228_s15, %s339_s5 }
 0x1f7   :  { %p234_p1 = pnand %p232_p0, %p229_p13 }
 0x1f9   :  { %237 = shalt.err (!%p234_p1)
}
 0x1fa   :  { %178 = dma.vmem_to_hbm [thread:$0]  %s173_s12, 256, %s339_s5, [#allocation6], %s243_s28, %s243_s28, %s244_s29  }
 0x1fb   :  { %240 = dma.done.wait [#allocation6], 256  }
 0x1fc   :  { %241 = vsyncadd [#allocation6], 4294967040 }
 0x1fd   :  { %182 = vsyncpa [#allocation5], 1 }
 0x1fe   :  { %183 = vsyncpa [#allocation6], 1 }

</bundles_post_ra>
